<compile_context>
chip_gen: v5e
topology: v5e:2x2
jax: 0.10.0
libtpu: 0.0.40
codegen_flags: <defaults>
</compile_context>

<pallas_src>
import numpy as np
import jax
import jax.numpy as jnp
from jax.experimental import pallas as pl
from jax.experimental.pallas import tpu as pltpu

TILE_K = 256                     # Cin reduction tile for the 3x3 conv (MXU-depth aligned)
RESIDENT_W_BYTES = 8 * 1024 * 1024   # keep conv weights fully VMEM-resident below this


# ----------------------------------------------------------------------------- kernels

def _ppm_branch_kernel(x_ref, w_ref, b_ref, o_ref):
    # Fused per-scale 1x1 conv + (folded) BN + ReLU. One grid step per pool scale.
    # x_ref: (1, Mpad, Cin) bf16, w_ref: (1, Cin, Cp) bf16 (BN scale pre-folded),
    # b_ref: (1, 1, Cp) f32, o_ref: (1, Mpad, Cp) bf16
    y = jnp.dot(x_ref[0], w_ref[0], preferred_element_type=jnp.float32)
    o_ref[0] = jnp.maximum(y + b_ref[0], 0.0).astype(o_ref.dtype)


def _make_conv_kernel(tile_h, W, tile_k, resident):
    """3x3 conv (folded BN) + ReLU + fused classifier (1x1 + bias + log_softmax).

    Grid = (band, Kt).  One (TILE_H+2)-row halo'd band per step, Cin tiled along the
    grid's last ("arbitrary") axis, f32 accumulator resident in VMEM across K.
      x_ref : (1, tile_h+2, W+2, tile_k) bf16
      w_ref : (kt*9, tile_k, Cout) bf16 if resident else (9, tile_k, Cout) bf16
      cb_ref: (1, Cout) f32        (folded BN bias)
      lw_ref: (Cout, Cpad) bf16    (classifier weight, padded classes = 0)
      lb_ref: (1, Cpad) f32        (classifier bias, padded classes = -1e30, MUST stay f32)
      o_ref : (tile_h*W, Cpad) f32 log-probs
      acc_ref: (tile_h*W, Cout) f32 scratch
    """
    tm = tile_h * W

    def kernel(x_ref, w_ref, cb_ref, lw_ref, lb_ref, o_ref, acc_ref):
        k = pl.program_id(1)

        @pl.when(k == 0)
        def _init():
            acc_ref[...] = jnp.zeros_like(acc_ref)

        band = x_ref[0]                                   # (tile_h+2, W+2, tile_k) bf16
        acc = acc_ref[...]
        wbase = k * 9 if resident else 0
        for kw in range(3):
            # One sublane-shift slice per kw; the 3 kh taps below are free row views.
            sub = band[:, kw:kw + W, :]                   # (tile_h+2, W, tile_k)
            for kh in range(3):
                patch = sub[kh:kh + tile_h].reshape(tm, tile_k)
                acc = acc + jnp.dot(patch, w_ref[wbase + kh * 3 + kw],
                                    preferred_element_type=jnp.float32)
        acc_ref[...] = acc

        @pl.when(k == pl.num_programs(1) - 1)
        def _finalize():
            h = jnp.maximum(acc + cb_ref[...], 0.0)       # folded BN bias + ReLU (f32)
            # Dropout2d(0.1): identity at inference.
            logits = jnp.dot(h.astype(jnp.bfloat16), lw_ref[...],
                             preferred_element_type=jnp.float32) + lb_ref[...]
            m = jnp.max(logits, axis=-1, keepdims=True)
            z = logits - m
            lse = jnp.log(jnp.sum(jnp.exp(z), axis=-1, keepdims=True))
            o_ref[...] = z - lse                          # log_softmax (padded lanes -> -inf-ish)

    return kernel


# ----------------------------------------------------------------------------- wrappers

def ppm_branches(pooled_all, w_all, b_all):
    S, mpad, cin = pooled_all.shape
    cp = w_all.shape[-1]
    return pl.pallas_call(
        _ppm_branch_kernel,
        out_shape=jax.ShapeDtypeStruct((S, mpad, cp), jnp.bfloat16),
        grid=(S,),
        in_specs=[
            pl.BlockSpec((1, mpad, cin), lambda i: (i, 0, 0)),
            pl.BlockSpec((1, cin, cp), lambda i: (i, 0, 0)),
            pl.BlockSpec((1, 1, cp), lambda i: (i, 0, 0)),
        ],
        out_specs=pl.BlockSpec((1, mpad, cp), lambda i: (i, 0, 0)),
        compiler_params=pltpu.CompilerParams(
            dimension_semantics=("parallel",)),
    )(pooled_all, w_all, b_all)


def conv3x3_cls_logsoftmax(xbands, w_all, conv_b, last_w, last_b, *,
                           n_bands, H, W, tile_h, tile_k, resident):
    # xbands: (n_bands, tile_h+2, W+2, cin_pad) bf16  (halo'd row bands)
    # w_all : (kt*9, tile_k, Cout) bf16  (row index = k*9 + kh*3 + kw, BN scale folded)
    # conv_b: (1, Cout) f32, last_w: (Cout, Cpad) bf16, last_b: (1, Cpad) f32
    hp2, wp, cin_pad = xbands.shape[1:]
    assert hp2 == tile_h + 2 and wp == W + 2 and cin_pad % tile_k == 0
    kt = cin_pad // tile_k
    cout = w_all.shape[-1]
    cpad = last_w.shape[-1]
    tm = tile_h * W

    if resident:
        w_spec = pl.BlockSpec((kt * 9, tile_k, cout), lambda g, k: (0, 0, 0))
    else:
        w_spec = pl.BlockSpec((9, tile_k, cout), lambda g, k: (k, 0, 0))

    kernel = _make_conv_kernel(tile_h, W, tile_k, resident)

    return pl.pallas_call(
        kernel,
        out_shape=jax.ShapeDtypeStruct((n_bands * tm, cpad), jnp.float32),
        grid_spec=pltpu.PrefetchScalarGridSpec(
            num_scalar_prefetch=0,
            grid=(n_bands, kt),
            in_specs=[
                pl.BlockSpec((1, hp2, wp, tile_k), lambda g, k: (g, 0, 0, k)),
                w_spec,
                pl.BlockSpec((1, cout), lambda g, k: (0, 0)),
                pl.BlockSpec((cout, cpad), lambda g, k: (0, 0)),
                pl.BlockSpec((1, cpad), lambda g, k: (0, 0)),
            ],
            out_specs=pl.BlockSpec((tm, cpad), lambda g, k: (g, 0)),
            scratch_shapes=[pltpu.VMEM((tm, cout), jnp.float32)],
        ),
        compiler_params=pltpu.CompilerParams(
            dimension_semantics=("parallel", "arbitrary"),
            vmem_limit_bytes=48 * 1024 * 1024,
        ),
    )(xbands, w_all, conv_b, last_w, last_b)


def _pick_tile_h(H, max_tile=16):
    for t in (16, 8, 4, 2):
        if t <= max_tile and H % t == 0 and H // t >= 2:
            return t
    return H


# ----------------------------------------------------------------------------- glue

def adaptive_avg_pool_nhwc(x, s):
    """Exact PyTorch AdaptiveAvgPool2d(s) semantics, NHWC input (tiny glue op)."""
    N, H, W, C = x.shape

    def bins(inp, out):
        return [(int(np.floor(i * inp / out)), int(np.ceil((i + 1) * inp / out)))
                for i in range(out)]

    hb, wb = bins(H, s), bins(W, s)
    rows = []
    for (h0, h1) in hb:
        cols = []
        for (w0, w1) in wb:
            cols.append(jnp.mean(x[:, h0:h1, w0:w1, :], axis=(1, 2)))
        rows.append(jnp.stack(cols, axis=1))
    return jnp.stack(rows, axis=1)  # (N, s, s, C)


def bilinear_matrix(out_size, in_size):
    """PyTorch F.interpolate(mode='bilinear', align_corners=False) weights (1-D)."""
    A = np.zeros((out_size, in_size), np.float32)
    if in_size == 1:
        A[:, 0] = 1.0
        return A
    scale = in_size / out_size
    for i in range(out_size):
        src = max((i + 0.5) * scale - 0.5, 0.0)
        i0 = min(int(np.floor(src)), in_size - 1)
        i1 = min(i0 + 1, in_size - 1)
        lam = src - i0
        A[i, i0] += 1.0 - lam
        A[i, i1] += lam
    return A


def fold_bn(gamma, beta, mean, var, eps=1e-5):
    scale = gamma / jnp.sqrt(var + eps)
    bias = beta - mean * scale
    return scale, bias


def init_raw_params(key, fc_dim, ppm_dim, num_class, pool_scales):
    keys = iter(jax.random.split(key, 64))
    raw = {"ppm": []}

    def bn(c):
        gamma = 0.5 + jax.random.uniform(next(keys), (c,), jnp.float32)
        beta = 0.1 * jax.random.normal(next(keys), (c,), jnp.float32)
        mean = 0.1 * jax.random.normal(next(keys), (c,), jnp.float32)
        var = 0.5 + jax.random.uniform(next(keys), (c,), jnp.float32)
        return gamma, beta, mean, var

    for _ in pool_scales:
        w = 0.1 * jax.random.normal(next(keys), (fc_dim, ppm_dim), jnp.float32)
        raw["ppm"].append((w, bn(ppm_dim)))

    cin_total = fc_dim + len(pool_scales) * ppm_dim
    w9 = 0.05 * jax.random.normal(next(keys), (9, cin_total, ppm_dim), jnp.float32)
    raw["conv3"] = (w9, bn(ppm_dim))

    wl = 0.1 * jax.random.normal(next(keys), (ppm_dim, num_class), jnp.float32)
    bl = 0.1 * jax.random.normal(next(keys), (1, num_class), jnp.float32)
    raw["last"] = (wl, bl)
    return raw


def prepare_params(raw, num_class, tile_k=TILE_K):
    """Fold BN scale into weights, pad to lane/tile-friendly shapes, cast MXU inputs to bf16."""
    prep = {"num_class": num_class}

    ws, bs = [], []
    for (w, (g, b, m, v)) in raw["ppm"]:
        sc, bi = fold_bn(g, b, m, v)
        ws.append((w * sc[None, :]).astype(jnp.bfloat16))
        bs.append(bi[None, :].astype(jnp.float32))
    prep["ppm_w"] = jnp.stack(ws, 0)          # (S, Cin, Cp) bf16
    prep["ppm_b"] = jnp.stack(bs, 0)          # (S, 1, Cp)  f32

    w9, (g2, b2, m2, v2) = raw["conv3"]
    sc2, bi2 = fold_bn(g2, b2, m2, v2)
    w9f = w9 * sc2[None, None, :]                        # (9, cin_total, cout)
    cin_total, cout = w9f.shape[1], w9f.shape[2]
    cin_pad = pl.cdiv(cin_total, tile_k) * tile_k
    kt = cin_pad // tile_k
    w9p = jnp.pad(w9f, ((0, 0), (0, cin_pad - cin_total), (0, 0))).astype(jnp.bfloat16)
    prep["cin_pad"] = cin_pad
    prep["conv3_w_taps"] = w9p                           # (9, cin_pad, cout) - reference only
    # Kernel layout: row index = k*9 + (kh*3 + kw)
    prep["conv3_w"] = (w9p.reshape(9, kt, tile_k, cout)
                          .transpose(1, 0, 2, 3)
                          .reshape(kt * 9, tile_k, cout))
    prep["conv3_b"] = bi2[None, :].astype(jnp.float32)

    wl, bl = raw["last"]
    cpad = pl.cdiv(num_class, 128) * 128
    prep["last_w"] = jnp.pad(wl, ((0, 0), (0, cpad - num_class))).astype(jnp.bfloat16)
    # Padded classes get a hugely negative bias so they vanish from log_softmax.
    # This bias MUST stay f32 (bf16 would overflow to -inf and poison z - lse).
    prep["last_b"] = jnp.concatenate(
        [bl.astype(jnp.float32),
         jnp.full((1, cpad - num_class), -1e30, jnp.float32)], axis=1)
    return prep


# ----------------------------------------------------------------------------- forward

def ppm_forward(conv_out, params, pool_scales, *, tile_h=None, tile_k=TILE_K):
    """PPM.forward with use_softmax=False (default). conv_out is a list; last entry NCHW."""
    conv5 = conv_out[-1]
    N, C, H, W = conv5.shape
    x_f32 = jnp.transpose(conv5, (0, 2, 3, 1)).astype(jnp.float32)   # NHWC
    x_bf16 = x_f32.astype(jnp.bfloat16)

    # --- pooled branches: all pool scales fused into ONE pallas_call ---
    rows = [N * s * s for s in pool_scales]
    mpad = ((max(rows) + 7) // 8) * 8
    pooled = []
    for s, r in zip(pool_scales, rows):
        p = adaptive_avg_pool_nhwc(x_f32, s).reshape(r, C)
        pooled.append(jnp.pad(p, ((0, mpad - r), (0, 0))))
    pooled_all = jnp.stack(pooled, 0).astype(jnp.bfloat16)           # (S, Mpad, C)

    branch_out = ppm_branches(pooled_all, params["ppm_w"], params["ppm_b"])  # bf16

    feats = [x_bf16]
    cp = params["ppm_w"].shape[-1]
    for i, (s, r) in enumerate(zip(pool_scales, rows)):
        y = branch_out[i, :r].reshape(N, s, s, cp)
        Ah = jnp.asarray(bilinear_matrix(H, s))
        Aw = jnp.asarray(bilinear_matrix(W, s))
        up = jnp.einsum('ha,wb,nabc->nhwc', Ah, Aw, y)               # tiny upsample (glue)
        feats.append(up.astype(jnp.bfloat16))

    cat = jnp.concatenate(feats, axis=-1)                            # (N,H,W,cin_total) bf16
    cin_total = cat.shape[-1]
    xpad = jnp.pad(cat, ((0, 0), (1, 1), (1, 1), (0, params["cin_pad"] - cin_total)))

    # Halo'd row bands so the conv kernel processes TILE_H output rows per step with
    # plain Blocked BlockSpecs (only ~1.25x input duplication vs 3x shifted-view reads).
    if tile_h is None:
        tile_h = _pick_tile_h(H)
    assert H % tile_h == 0
    HB = H // tile_h
    xbands = jnp.stack(
        [xpad[:, i * tile_h:i * tile_h + tile_h + 2] for i in range(HB)], axis=1)
    xbands = xbands.reshape(N * HB, tile_h + 2, W + 2, params["cin_pad"])
    # TODO(synk): the concat+pad+band HBM materialization could be removed entirely by
    # feeding the un-padded sources via memory_space=pl.ANY with manual halo DMA.

    # Keep the folded 3x3 weight fully VMEM-resident when small (one DMA total);
    # stream it per K-tile otherwise (the safe choice for v7x's 64 MiB VMEM).
    resident = int(params["conv3_w"].size) * 2 <= RESIDENT_W_BYTES

    out2d = conv3x3_cls_logsoftmax(
        xbands, params["conv3_w"], params["conv3_b"],
        params["last_w"], params["last_b"],
        n_bands=N * HB, H=H, W=W, tile_h=tile_h, tile_k=tile_k, resident=resident)

    nc = params["num_class"]
    return out2d.reshape(N, H, W, -1)[..., :nc].transpose(0, 3, 1, 2)  # back to NCHW
    # TODO(synk): use_softmax=True branch (bilinear resize to segSize + softmax) not exercised.


def ref_forward(conv_out, params, pool_scales):
    """Pure-JAX reference using the SAME prepared (folded, bf16) params."""
    conv5 = conv_out[-1]
    N, C, H, W = conv5.shape
    x = jnp.transpose(conv5, (0, 2, 3, 1)).astype(jnp.float32)
    x_bf = x.astype(jnp.bfloat16)
    cp = params["ppm_w"].shape[-1]

    feats = [x_bf]
    for i, s in enumerate(pool_scales):
        pooled = adaptive_avg_pool_nhwc(x, s).reshape(N * s * s, C).astype(jnp.bfloat16)
        y = jnp.dot(pooled, params["ppm_w"][i], preferred_element_type=jnp.float32)
        y = jnp.maximum(y + params["ppm_b"][i], 0.0).astype(jnp.bfloat16).reshape(N, s, s, cp)
        Ah = jnp.asarray(bilinear_matrix(H, s))
        Aw = jnp.asarray(bilinear_matrix(W, s))
        feats.append(jnp.einsum('ha,wb,nabc->nhwc', Ah, Aw, y).astype(jnp.bfloat16))

    cat = jnp.concatenate(feats, axis=-1)
    cin_total = cat.shape[-1]
    pad = jnp.pad(cat, ((0, 0), (1, 1), (1, 1), (0, params["cin_pad"] - cin_total)))
    w9 = params["conv3_w_taps"]
    acc = jnp.zeros((N, H, W, cp), jnp.float32)
    for kh in range(3):
        for kw in range(3):
            acc = acc + jnp.einsum('nhwc,cd->nhwd',
                                   pad[:, kh:kh + H, kw:kw + W, :], w9[kh * 3 + kw],
                                   preferred_element_type=jnp.float32)
    h = jnp.maximum(acc + params["conv3_b"][0], 0.0).astype(jnp.bfloat16)
    h = h.reshape(N * H * W, cp)

    nc = params["num_class"]
    logits = jnp.dot(h, params["last_w"][:, :nc],
                     preferred_element_type=jnp.float32) + params["last_b"][:, :nc]
    lsm = jax.nn.log_softmax(logits, axis=-1)
    return lsm.reshape(N, H, W, nc).transpose(0, 3, 1, 2)


# ----------------------------------------------------------------------------- main

if __name__ == "__main__":
    key = jax.random.PRNGKey(0)
    k_in, k_par = jax.random.split(key)

    N, fc_dim, H, W = 2, 32, 16, 16
    ppm_dim, num_class = 64, 8            # small stand-ins for 512 / 150
    pool_scales = (1, 2, 3, 6)

    conv5 = jax.random.normal(k_in, (N, fc_dim, H, W), jnp.float32)   # NCHW, like PyTorch
    raw = init_raw_params(k_par, fc_dim, ppm_dim, num_class, pool_scales)
    params = prepare_params(raw, num_class)

    out = ppm_forward([conv5], params, pool_scales)
    out = jax.block_until_ready(out)

    assert out.shape == (N, num_class, H, W), out.shape
    # log_softmax property: exp over the channel dim sums to 1
    probs_sum = jnp.exp(out).sum(axis=1)
    assert bool(jnp.allclose(probs_sum, 1.0, atol=1e-2)), "log_softmax normalization failed"
    # consistency vs. pure-JAX reference using identical (folded, bf16) parameters
    ref = jax.block_until_ready(ref_forward([conv5], params, pool_scales))
    assert bool(jnp.allclose(out, ref, atol=5e-2, rtol=5e-2)), "mismatch vs JAX reference"

    print("KERNEL_OK")
</pallas_src>

<mosaic_0001>
module attributes {stable_mosaic.version = 11 : i64} {
  func.func @_ppm_branch_kernel(%arg0: i32, %arg1: memref<1x72x32xbf16, #tpu.memory_space<vmem>>, %arg2: memref<1x32x64xbf16, #tpu.memory_space<vmem>>, %arg3: memref<1x1x64xf32, #tpu.memory_space<vmem>>, %arg4: memref<1x72x64xbf16, #tpu.memory_space<vmem>>) attributes {dimension_semantics = [#tpu.dimension_semantics<parallel>], iteration_bounds = array<i64: 4>, scalar_prefetch = 0 : i64, scratch_operands = 0 : i64, tpu.core_type = #tpu.core_type<tc>, window_params = [{transform_indices = @transform_0, window_bounds = array<i64: 1, 72, 32>}, {transform_indices = @transform_1, window_bounds = array<i64: 1, 32, 64>}, {transform_indices = @transform_2, window_bounds = array<i64: 1, 1, 64>}, {transform_indices = @transform_3, window_bounds = array<i64: 1, 72, 64>}]} {
    %c0 = arith.constant 0 : index
    %c0_0 = arith.constant 0 : index
    %c0_1 = arith.constant 0 : index
    %0 = vector.load %arg1[%c0, %c0_0, %c0_1] : memref<1x72x32xbf16, #tpu.memory_space<vmem>>, vector<1x72x32xbf16>
    %1 = vector.shape_cast %0 : vector<1x72x32xbf16> to vector<72x32xbf16>
    %c0_2 = arith.constant 0 : index
    %c0_3 = arith.constant 0 : index
    %c0_4 = arith.constant 0 : index
    %2 = vector.load %arg2[%c0_2, %c0_3, %c0_4] : memref<1x32x64xbf16, #tpu.memory_space<vmem>>, vector<1x32x64xbf16>
    %3 = vector.shape_cast %2 : vector<1x32x64xbf16> to vector<32x64xbf16>
    %cst = arith.constant dense<0.000000e+00> : vector<72x64xf32>
    %4 = tpu.matmul %1, %3, %cst {dimension_numbers = #tpu.dot_dimension_numbers<[1], [0], [0], [1], [0, 0, 1, 1], [], []>} : vector<72x32xbf16>, vector<32x64xbf16>, vector<72x64xf32> -> vector<72x64xf32>
    %c0_5 = arith.constant 0 : index
    %c0_6 = arith.constant 0 : index
    %c0_7 = arith.constant 0 : index
    %5 = vector.load %arg3[%c0_5, %c0_6, %c0_7] : memref<1x1x64xf32, #tpu.memory_space<vmem>>, vector<1x1x64xf32>
    %6 = vector.shape_cast %5 : vector<1x1x64xf32> to vector<1x64xf32>
    %7 = vector.broadcast %6 : vector<1x64xf32> to vector<72x64xf32>
    %8 = arith.addf %4, %7 : vector<72x64xf32>
    %cst_8 = arith.constant 0.000000e+00 : f32
    %9 = vector.broadcast %cst_8 : f32 to vector<72x64xf32>
    %10 = arith.maximumf %8, %9 : vector<72x64xf32>
    %11 = arith.truncf %10 : vector<72x64xf32> to vector<72x64xbf16>
    %c0_9 = arith.constant 0 : index
    %c0_10 = arith.constant 0 : index
    %c0_11 = arith.constant 0 : index
    %12 = vector.load %arg4[%c0_9, %c0_10, %c0_11] : memref<1x72x64xbf16, #tpu.memory_space<vmem>>, vector<1x72x64xbf16>
    %13 = vector.shape_cast %12 : vector<1x72x64xbf16> to vector<72x64xbf16>
    %14 = vector.shape_cast %11 : vector<72x64xbf16> to vector<1x72x64xbf16>
    tpu.vector_store %arg4[%c0_9, %c0_10, %c0_11], %14 {strides = array<i32>} : memref<1x72x64xbf16, #tpu.memory_space<vmem>>, vector<1x72x64xbf16>,
    return
  }
  func.func @transform_0(%arg0: i32) -> (i32, i32, i32) {
    %c0_i32 = arith.constant 0 : i32
    %c0_i32_0 = arith.constant 0 : i32
    %c0_i32_1 = arith.constant 0 : i32
    return %arg0, %c0_i32, %c0_i32_0 : i32, i32, i32
  }
  func.func @transform_1(%arg0: i32) -> (i32, i32, i32) {
    %c0_i32 = arith.constant 0 : i32
    %c0_i32_0 = arith.constant 0 : i32
    %c0_i32_1 = arith.constant 0 : i32
    return %arg0, %c0_i32, %c0_i32_0 : i32, i32, i32
  }
  func.func @transform_2(%arg0: i32) -> (i32, i32, i32) {
    %c0_i32 = arith.constant 0 : i32
    %c0_i32_0 = arith.constant 0 : i32
    %c0_i32_1 = arith.constant 0 : i32
    return %arg0, %c0_i32, %c0_i32_0 : i32, i32, i32
  }
  func.func @transform_3(%arg0: i32) -> (i32, i32, i32) {
    %c0_i32 = arith.constant 0 : i32
    %c0_i32_0 = arith.constant 0 : i32
    %c0_i32_1 = arith.constant 0 : i32
    return %arg0, %c0_i32, %c0_i32_0 : i32, i32, i32
  }
}

</mosaic_0001>

<bundles_post_ra>
// kernel: tpu_custom_call.1
= control target key start
LH: loop header
LB: loop body
LE: loop exit
PB: predicated region body
PF: predicated region fallthrough
CT: control target
= control target key end

     0   :  { %s502_s12 = smov 0   ;;  %s554_s0 = inlined_call_operand.vmem [shape: bf16[4,72,32], index: 0, kind: input, shape index: {}]   ;;  %s555_s1 = inlined_call_operand.vmem [shape: bf16[4,32,64], index: 1, kind: input, shape index: {}]   ;;  %s556_s2 = inlined_call_operand.vmem [shape: f32[4,1,64], index: 2, kind: input, shape index: {}]   ;;  %s557_s3 = inlined_call_operand.vmem [shape: bf16[4,72,64], index: 3, kind: output, shape index: {}]  }
   0x1 LB: > { %s411_s13 = sadd.s32 4294967295, %s480_s12   ;;  %p415_p0 = scmp.ge.s32.totalorder %s480_s12, 1  ;;  %s480_s12 = sphi %s502_s12, %s13_s12  }
   0x2   : > { %p155_p1 = scmp.lt.s32.totalorder %s480_s12, 5 }
   0x4   : > { %p156_p2 = pnand %p415_p0, %p155_p1 }
   0x5   : > { %p187_p3 = scmp.lt.s32.totalorder (!%p156_p2), %s411_s13, 3 }
   0x6   : > { %159 = sbr.rel (%p156_p2) target bundleno = 185 (0xb9), region = 32 }
   0xb   : > { %s559_s13 = smov (!%p187_p3, %s411_s13), 3  ;;  %vm258_vm0 = vcmask 261120   ;;  %vm325_vm1 = vcmask 519168  }
   0xc   : > { %s464_s14 = smul.u32 36, %s559_s13  ;;  %s451_s15 = sshll.u32 %s559_s13, 4 }
   0xd   : > { %s196_s18 = scalar_lea.vmem %s555_s1, %s451_s15  ;;  %s199_s21 = scalar_lea.vmem %s556_s2, %s559_s13 }
   0xe   : > { %v457_v0 = vld [vmem:[%s196_s18 + $0x8] sm:$0xff]  ;;  %s191_s24 = scalar_lea.vmem %s554_s0, %s464_s14  ;;  %v456_v1 = vld [vmem:[%s196_s18] sm:$0xff]  ;;  %s531_s27 = scalar_lea.vmem %s557_s3, %s464_s14 }
   0xf   : > { %459 = vmatpush.bf16.msra.mxu2 %v457_v0  ;;  %280 = vmatpush.bf16.msra.mxu0 %v457_v0  ;;  %v214_v2 = vld [vmem:[%s191_s24 + $0x20] sm:$0xf]  ;;  %v454_v4 = vld [vmem:[%s191_s24 + $0x10] sm:$0xff]  ;;  %v453_v6 = vld [vmem:[%s191_s24 + $0x8] sm:$0xff] }
  0x10   : > { %458 = vmatpush.bf16.msra.mxu1 %v457_v0  ;;  %460 = vmatpush.bf16.msra.mxu3 %v457_v0  ;;  %v240_v3 = vunpack.c.l.b16 %v214_v2  ;;  %v452_v5 = vld [vmem:[%s191_s24] sm:$0xff]  ;;  %v455_v8 = vld [vmem:[%s191_s24 + $0x18] sm:$0xff] }
  0x11   : > { %v473_v9 = vld [vmem:[%s199_s21] ss:$0 sm:$0xff] }
  0x12   : > { %v245_v7 = vpack.c.b16 %v240_v3, %v240_v3 }
  0x13   : > { %462 = vmatpush.bf16.msra.mxu2 %v456_v1  ;;  %281 = vmatpush.bf16.msra.mxu0 %v456_v1 }
  0x14   : > { %461 = vmatpush.bf16.msra.mxu1 %v456_v1  ;;  %463 = vmatpush.bf16.msra.mxu3 %v456_v1 }
  0x16   : > { %446 = vmatmul.msk.bf16.vlgmr.msra.gmra.mxu2 %vm258_vm0, %v454_v4  ;;  %444 = vmatmul.msk.bf16.vlgmr.msra.gmra.mxu0 %vm258_vm0, %v452_v5 }
  0x17   : > { %445 = vmatmul.msk.bf16.vlgmr.msra.gmra.mxu1 %vm258_vm0, %v453_v6  ;;  %448 = vmatmul.msk.bf16.vlgmr.msra.gmra.mxu3 %vm258_vm0, %v245_v7 }
  0x26   : > { %447 = vmatmul.msk.bf16.gmra.mxu2 %vm258_vm0, %v455_v8 }
  0x93   : > { %v283_v10 = vpop.f32.mrf.mxu0 }
  0x94   : > { %v284_v11 = vadd.f32 %v473_v9, %v283_v10  ;;  %v288_v12 = vpop.f32.mrf.mxu1 }
  0x95   : > { %v289_v13 = vadd.f32 %v473_v9, %v288_v12 }
  0x96   : > { %v307_v14 = vmax.f32 %v284_v11, 0.0 }
  0x97   : > { %v309_v15 = vmax.f32 %v289_v13, 0.0 }
  0x98   : > { %v316_v16 = vpack.c.bf16 %v307_v14, %v307_v14 }
  0x99   : > { %v293_v17 = vpop.f32.mrf.mxu2  ;;  %v318_v18 = vpack.c.bf16 %v309_v15, %v309_v15 }
  0x9a   : > { %v294_v19 = vadd.f32 %v473_v9, %v293_v17  ;;  %326 = vst.msk [vmem:[%s531_s27] sm:$0xf] %vm325_vm1, %v316_v16  ;;  %v303_v20 = vpop.f32.mrf.mxu3 }
  0x9b   : > { %328 = vst.msk [vmem:[%s531_s27 + $0x8] sm:$0xf] %vm325_vm1, %v318_v18  ;;  %v304_v21 = vadd.f32 %v473_v9, %v303_v20  ;;  %v285_v22 = vpop.f32.mrf.mxu0 }
  0x9c   : > { %v311_v23 = vmax.f32 %v294_v19, 0.0  ;;  %v286_v24 = vadd.f32 %v473_v9, %v285_v22  ;;  %v290_v25 = vpop.f32.mrf.mxu1 }
  0x9d   : > { %v315_v26 = vmax.f32 %v304_v21, 0.0  ;;  %v291_v27 = vadd.f32 %v473_v9, %v290_v25 }
  0x9e   : > { %v320_v28 = vpack.c.bf16 %v311_v23, %v311_v23  ;;  %v308_v29 = vmax.f32 %v286_v24, 0.0 }
  0x9f   : > { %v324_v30 = vpack.c.bf16 %v315_v26, %v315_v26  ;;  %v310_v31 = vmax.f32 %v291_v27, 0.0 }
  0xa0   : > { %330 = vst.msk [vmem:[%s531_s27 + $0x10] sm:$0xf] %vm325_vm1, %v320_v28  ;;  %v317_v32 = vpack.c.bf16 %v308_v29, %v308_v29 }
  0xa1   : > { %v295_v33 = vpop.f32.mrf.mxu2  ;;  %334 = vst.msk [vmem:[%s531_s27 + $0x20] sm:$0xf] %vm325_vm1, %v324_v30  ;;  %v319_v34 = vpack.c.bf16 %v310_v31, %v310_v31 }
  0xa2   : > { %v296_v35 = vadd.f32 %v473_v9, %v295_v33  ;;  %327 = vst.msk [vmem:[%s531_s27 + $0x4] sm:$0xf] %vm325_vm1, %v317_v32  ;;  %v305_v36 = vpop.f32.mrf.mxu3 }
  0xa3   : > { %329 = vst.msk [vmem:[%s531_s27 + $0xc] sm:$0xf] %vm325_vm1, %v319_v34 }
  0xa4   : > { %v312_v37 = vmax.f32 %v296_v35, 0.0 }
  0xa6   : > { %v321_v38 = vpack.c.bf16 %v312_v37, %v312_v37 }
  0xa8   : > { %331 = vst.msk [vmem:[%s531_s27 + $0x14] sm:$0xf] %vm325_vm1, %v321_v38 }
  0xa9   : > { %v298_v39 = vpop.f32.mrf.mxu2 }
  0xaa   : > { %v299_v40 = vadd.f32 %v473_v9, %v298_v39 }
  0xac   : > { %v313_v41 = vmax.f32 %v299_v40, 0.0 }
  0xae   : > { %v322_v42 = vpack.c.bf16 %v313_v41, %v313_v41 }
  0xb0   : > { %332 = vst.msk [vmem:[%s531_s27 + $0x18] sm:$0xf] %vm325_vm1, %v322_v42 }
  0xb1   : > { %v300_v43 = vpop.f32.mrf.mxu2 }
  0xb2   : > { %v301_v44 = vadd.f32 %v473_v9, %v300_v43 }
  0xb4   : > { %v314_v45 = vmax.f32 %v301_v44, 0.0 }
  0xb6   : > { %v323_v46 = vpack.c.bf16 %v314_v45, %v314_v45 }
  0xb8   : > { %333 = vst.msk [vmem:[%s531_s27 + $0x1c] sm:$0xf] %vm325_vm1, %v323_v46 }
  0xb9 PF: > { %s13_s12 = sadd.s32 1, %s480_s12  }
  0xba   : > { %p10_p4 = scmp.ge.s32.totalorder %s13_s12, 6  }
  0xbc   :  { %12 = sbr.rel (!%p10_p4) target bundleno = 1 (0x1), region = 68 }

</bundles_post_ra>
